<compile_context>
chip_gen: v7x
topology: tpu7x:2x2x1
jax: 0.10.0
libtpu: 0.0.40
codegen_flags: <defaults>
</compile_context>

<pallas_src>
import math

import jax
import jax.numpy as jnp
from jax.experimental import pallas as pl
from jax.experimental.pallas import tpu as pltpu

_LANE = 128


def make_positional_encoding(embedding_dim: int, sentence_len: int = 128,
                             dtype=jnp.float32) -> jnp.ndarray:
    """Sinusoidal table identical to the PyTorch __init__ double loop.

    For odd embedding_dim the last column stays zero, exactly like the
    reference loop (which only fills columns 2*i and 2*i+1 for i < D // 2).
    """
    half = embedding_dim // 2
    pos = jnp.arange(sentence_len, dtype=jnp.float32)[:, None]       # (S, 1)
    i = jnp.arange(half, dtype=jnp.float32)[None, :]                 # (1, D//2)
    inv_freq = jnp.power(10000.0, 2.0 * i / embedding_dim)           # (1, D//2)
    angles = pos / inv_freq                                          # (S, D//2)
    pe = jnp.stack([jnp.sin(angles), jnp.cos(angles)], axis=-1)      # (S, D//2, 2)
    pe = pe.reshape(sentence_len, 2 * half)                          # interleaved
    if embedding_dim % 2 == 1:
        pe = jnp.concatenate(
            [pe, jnp.zeros((sentence_len, 1), jnp.float32)], axis=1)
    return pe.astype(dtype)


def _pos_enc_kernel(x_ref, pe_ref, o_ref):
    # x_ref / o_ref: (batch, TILE_F); pe_ref: (1, TILE_F) broadcast over batch.
    o_ref[...] = x_ref[...] + pe_ref[...]


def _choose_tile_f(flat_len: int, batch: int, itemsize: int,
                   target_block_bytes: int) -> int:
    """Largest lane-dense (multiple-of-128) tile along the flattened seq*emb
    axis such that one x block (batch, tile) is ~target_block_bytes."""
    per_elem_bytes = max(1, batch * itemsize)
    tile = (target_block_bytes // per_elem_bytes) // _LANE * _LANE
    tile = max(_LANE, tile)
    if tile >= flat_len:
        return flat_len           # full-extent block: always layout-legal
    return tile                   # multiple of 128, partial edge block is fine


def positional_encoding_forward(x: jnp.ndarray, pe_table: jnp.ndarray,
                                target_block_bytes: int = 2 * 1024 * 1024
                                ) -> jnp.ndarray:
    """out = x + pe_table[:x.shape[1], :], broadcast over batch."""
    batch, seq_len, emb = x.shape
    table_len, table_emb = pe_table.shape
    if seq_len > table_len:
        raise ValueError(
            f"seq_len={seq_len} exceeds sentence_len={table_len} of PE table")
    if emb != table_emb:
        raise ValueError(
            f"embedding_dim mismatch: x has {emb}, PE table has {table_emb}")

    # Cast once outside the kernel (removes a per-block VPU cast; halves PE DMA
    # bytes when x is bf16). Static slice is cheap wrapper glue.
    pe_slice = pe_table[:seq_len, :].astype(x.dtype)

    # Flatten (seq, emb) -> one lane-dense axis; contiguous merge, no data move.
    flat = seq_len * emb
    x2 = x.reshape(batch, flat)
    pe2 = pe_slice.reshape(1, flat)

    itemsize = jnp.dtype(x.dtype).itemsize
    tile_f = _choose_tile_f(flat, batch, itemsize, target_block_bytes)
    grid = (pl.cdiv(flat, tile_f),)

    out2 = pl.pallas_call(
        _pos_enc_kernel,
        out_shape=jax.ShapeDtypeStruct((batch, flat), x.dtype),
        grid_spec=pltpu.PrefetchScalarGridSpec(
            num_scalar_prefetch=0,
            grid=grid,
            in_specs=[
                # x block: full batch rows x lane-dense flat tile.
                pl.BlockSpec((batch, tile_f), lambda f: (0, f)),
                # PE tile matches the x tile along the flat axis (one row,
                # broadcast over batch inside the kernel).
                pl.BlockSpec((1, tile_f), lambda f: (0, f)),
            ],
            out_specs=pl.BlockSpec((batch, tile_f), lambda f: (0, f)),
        ),
        compiler_params=pltpu.CompilerParams(
            dimension_semantics=("parallel",),          # shardable across TCs on v7x
            vmem_limit_bytes=32 * 1024 * 1024,          # explicit budget (safe on v5e/v6e/v7x)
        ),
        # Note: callers that can donate x may additionally pass
        # input_output_aliases={0: 0} to avoid a second HBM activation buffer.
    )(x2, pe2)

    return out2.reshape(batch, seq_len, emb)


if __name__ == "__main__":
    # --- primary test: the module's demo-sized shapes -----------------------
    batch, seq_len, embedding_dim, sentence_len = 2, 8, 32, 128

    key = jax.random.PRNGKey(0)
    x = jax.random.normal(key, (batch, seq_len, embedding_dim), dtype=jnp.float32)

    pe_table = make_positional_encoding(embedding_dim, sentence_len, dtype=jnp.float32)

    out = positional_encoding_forward(x, pe_table)
    out = jax.block_until_ready(out)

    ref = x + pe_table[:seq_len, :][None, :, :]
    assert out.shape == (batch, seq_len, embedding_dim)
    assert jnp.allclose(out, ref, atol=1e-6), "mismatch vs reference (f32)"

    # --- secondary test: bf16 input, multi-tile grid (tiny target tile) -----
    b2, s2, e2 = 3, 16, 24                      # flat = 384 = 3 x 128
    x_bf16 = jax.random.normal(jax.random.PRNGKey(1), (b2, s2, e2),
                               dtype=jnp.float32).astype(jnp.bfloat16)
    pe2_table = make_positional_encoding(e2, sentence_len, dtype=jnp.float32)
    out_bf16 = positional_encoding_forward(x_bf16, pe2_table,
                                           target_block_bytes=1024)  # force >1 tile
    out_bf16 = jax.block_until_ready(out_bf16)
    ref_bf16 = x_bf16 + pe2_table[:s2, :].astype(jnp.bfloat16)[None, :, :]
    assert jnp.allclose(out_bf16.astype(jnp.float32),
                        ref_bf16.astype(jnp.float32), atol=1e-2), \
        "mismatch vs reference (bf16, multi-tile)"

    print("KERNEL_OK")
</pallas_src>

<mosaic_0001>
module attributes {stable_mosaic.version = 11 : i64} {
  func.func @_pos_enc_kernel(%arg0: i32, %arg1: memref<2x256xf32, #tpu.memory_space<vmem>>, %arg2: memref<1x256xf32, #tpu.memory_space<vmem>>, %arg3: memref<2x256xf32, #tpu.memory_space<vmem>>) attributes {dimension_semantics = [#tpu.dimension_semantics<parallel>], iteration_bounds = array<i64: 1>, scalar_prefetch = 0 : i64, scratch_operands = 0 : i64, tpu.core_type = #tpu.core_type<tc>, window_params = [{transform_indices = @transform_0, window_bounds = array<i64: 2, 256>}, {transform_indices = @transform_1, window_bounds = array<i64: 1, 256>}, {transform_indices = @transform_2, window_bounds = array<i64: 2, 256>}]} {
    %c0 = arith.constant 0 : index
    %c0_0 = arith.constant 0 : index
    %0 = vector.load %arg1[%c0, %c0_0] : memref<2x256xf32, #tpu.memory_space<vmem>>, vector<2x256xf32>
    %c0_1 = arith.constant 0 : index
    %c0_2 = arith.constant 0 : index
    %1 = vector.load %arg2[%c0_1, %c0_2] : memref<1x256xf32, #tpu.memory_space<vmem>>, vector<1x256xf32>
    %2 = vector.broadcast %1 : vector<1x256xf32> to vector<2x256xf32>
    %3 = arith.addf %0, %2 : vector<2x256xf32>
    %c0_3 = arith.constant 0 : index
    %c0_4 = arith.constant 0 : index
    %4 = vector.load %arg3[%c0_3, %c0_4] : memref<2x256xf32, #tpu.memory_space<vmem>>, vector<2x256xf32>
    tpu.vector_store %arg3[%c0_3, %c0_4], %3 {strides = array<i32>} : memref<2x256xf32, #tpu.memory_space<vmem>>, vector<2x256xf32>,
    return
  }
  func.func @transform_0(%arg0: i32) -> (i32, i32) {
    %c0_i32 = arith.constant 0 : i32
    %c0_i32_0 = arith.constant 0 : i32
    return %c0_i32, %arg0 : i32, i32
  }
  func.func @transform_1(%arg0: i32) -> (i32, i32) {
    %c0_i32 = arith.constant 0 : i32
    %c0_i32_0 = arith.constant 0 : i32
    return %c0_i32, %arg0 : i32, i32
  }
  func.func @transform_2(%arg0: i32) -> (i32, i32) {
    %c0_i32 = arith.constant 0 : i32
    %c0_i32_0 = arith.constant 0 : i32
    return %c0_i32, %arg0 : i32, i32
  }
}

</mosaic_0001>

<bundles_post_ra>
// kernel: tpu_custom_call.1
= control target key start
LH: loop header
LB: loop body
LE: loop exit
PB: predicated region body
PF: predicated region fallthrough
CT: control target
= control target key end

     0   :  { %7 = vsyncpa [#allocation3], 0  ;;  %s157_s0 = inlined_call_operand.hbm [shape: f32[2,256], index: 0, kind: input, shape index: {}]   ;;  %s158_s1 = inlined_call_operand.vmem [shape: f32[1,256], index: 1, kind: input, shape index: {}]   ;;  %s159_s2 = inlined_call_operand.hbm [shape: f32[2,256], index: 2, kind: output, shape index: {}]  }
   0x1   :  { %8 = vsyncpa [#allocation4], 0  ;;  %s112_s9 = smov [#allocation2]   ;;  %s64_s13 = scalar_lea.hbm %s157_s0, 64 }
   0x2   :  { %s15_s10 = sshll.u32 %s112_s9, 4  ;;  %p65_p0 = scmp.ne.s32.totalorder %s157_s0, %s64_s13  ;;  %s16_s10 = int_to_ptr.vmem [resolvable:$true] %s15_s10 }
   0x3   :  { %p68_p1 = scmp.lt.u32.totalorder %s64_s13, %s157_s0 }
   0x5   :  { %p70_p2 = pnand %p68_p1, %p65_p0 }
   0x7   :  { %73 = shalt.err (!%p70_p2)
}
   0x8   :  { %s74_s18 = scalar_lea.vmem %s16_s10, 64  ;;  %p79_p4 = scmp.lt.s32.totalorder %s16_s10, %s16_s10 }
   0x9   :  { %p75_p3 = scmp.ne.s32.totalorder %s16_s10, %s74_s18  ;;  %p80_p5 = scmp.lt.s32.totalorder %s74_s18, %s74_s18 }
   0xb   :  { %p81_p6 = por %p80_p5, %p79_p4 }
   0xd   :  { %p82_p7 = pnand %p81_p6, %p75_p3 }
   0xf   :  { %85 = shalt.err (!%p82_p7)
}
  0x10   :  { %18 = dma.hbm_to_vmem [thread:$0]  %s157_s0, 64, %s16_s10, [#allocation3]  }
  0x11   :  { %108 = dma.done.wait [#allocation3], 64  }
  0x12   :  { %109 = vsyncadd [#allocation3], 4294967232  ;;  %v27_v0 = vlaneseq  ;;  %v113_v1 = vmov 1983009808   ;;  %v25_v7 = vld [vmem:[%s158_s1] sm:$0x3] }
  0x13   :  { %v37_v2 = vunpack.c.l.s4 %v113_v1  ;;  %v24_v12 = vld [vmem:[#allocation2] sm:$0xf]  ;;  %s114_s23 = smov [#allocation5]  }
  0x14   :  { %v28_v3 = vshrl.u32 %v27_v0, 7  ;;  %s52_s0 = sshll.u32 %s114_s23, 4  ;;  %s53_s0 = int_to_ptr.vmem [resolvable:$true] %s52_s0 }
  0x15   :  { %v38_v6 = vunpack.c.0.s8 %v37_v2  ;;  %s86_s24 = scalar_lea.vmem %s53_s0, 64  ;;  %p91_p9 = scmp.lt.s32.totalorder %s53_s0, %s53_s0 }
  0x16   :  { %v29_v4 = vsub.s32 0, %v28_v3  ;;  %v33_v5 = vsub.s32 1, %v28_v3  ;;  %p87_p8 = scmp.ne.s32.totalorder %s53_s0, %s86_s24  ;;  %p92_p10 = scmp.lt.s32.totalorder %s86_s24, %s86_s24 }
  0x17   :  { %v41_v10 = vsub.s32 %v38_v6, %v28_v3 }
  0x18   :  { %v30_v8 = vrot.slane %v25_v7, %v29_v4  ;;  %v34_v9 = vrot.slane %v25_v7, %v33_v5  ;;  %p93_p11 = por %p92_p10, %p91_p9 }
  0x1a   :  { %v35_v11 = vcombine.low %v30_v8, %v34_v9  ;;  %p94_p12 = pnand %p93_p11, %p87_p8 }
  0x1c   :  { %v42_v13 = vrot.slane %v35_v11, %v41_v10 }
  0x1e   :  { %v44_v14 = vadd.f32 %v42_v13, %v24_v12 }
  0x20   :  { %45 = vst [vmem:[#allocation5] sm:$0xf] %v44_v14 }
  0x21   :  { %97 = shalt.err (!%p94_p12)
}
  0x22   :  { %s98_s26 = scalar_lea.hbm %s159_s2, 64 }
  0x23   :  { %p99_p13 = scmp.ne.s32.totalorder %s159_s2, %s98_s26  ;;  %p102_p0 = scmp.lt.u32.totalorder %s98_s26, %s159_s2 }
  0x25   :  { %p104_p1 = pnand %p102_p0, %p99_p13 }
  0x27   :  { %107 = shalt.err (!%p104_p1)
}
  0x28   :  { %55 = dma.vmem_to_hbm [thread:$0]  %s53_s0, 64, %s159_s2, [#allocation4]  }
  0x29   :  { %110 = dma.done.wait [#allocation4], 64  }
  0x2a   :  { %111 = vsyncadd [#allocation4], 4294967232 }
  0x2b   :  { %59 = vsyncpa [#allocation3], 1 }
  0x2c   :  { %60 = vsyncpa [#allocation4], 1 }

</bundles_post_ra>
